<compile_context>
chip_gen: v7x
topology: tpu7x:2x2x1
jax: 0.10.0
libtpu: 0.0.40
codegen_flags: <defaults>
</compile_context>

<pallas_src>
import jax
import jax.numpy as jnp
from jax.experimental import pallas as pl
from jax.experimental.pallas import tpu as pltpu


def se_kernel(x_ref, w1_ref, w2_ref, o_ref):
    # x_ref/o_ref: (Bt, C, L); w1_ref: (C, H) f32; w2_ref: (H, C) f32
    x = x_ref[...]                                   # stays in input dtype
    inv_l = jnp.float32(1.0 / x_ref.shape[-1])

    # ---- squeeze: mean over L, accumulated in f32 (no f32 copy kept live) ----
    y = jnp.sum(x, axis=-1, dtype=jnp.float32) * inv_l            # (Bt, C)

    # ---- excitation: batched Linear -> ReLU -> Linear -> Sigmoid ----
    h = jnp.dot(y, w1_ref[...], preferred_element_type=jnp.float32)  # (Bt, H)
    h = jnp.maximum(h, 0.0)
    s = jnp.dot(h, w2_ref[...], preferred_element_type=jnp.float32)  # (Bt, C)
    s = jax.nn.sigmoid(s)

    # ---- scale: broadcast per-channel gate over L, in the input dtype ----
    o_ref[...] = (x * s.astype(x.dtype)[:, :, None]).astype(o_ref.dtype)


def _pick_block_b(B, C, L, itemsize, target_bytes=4 << 20, min_steps=4):
    """Largest divisor of B whose (Bt, C, L) block is ~target_bytes,
    while keeping at least min(min_steps, B) grid steps."""
    per_b = max(1, C * L * itemsize)
    cap = max(1, target_bytes // per_b)
    cap = min(cap, max(1, B // min(min_steps, B)))
    bt = 1
    for d in range(1, B + 1):
        if B % d == 0 and d <= cap:
            bt = d
    return bt


def se_layer_1d(x, w1, w2):
    """x: (B, C, L); w1: (C, C//r) = W1^T; w2: (C//r, C) = W2^T."""
    B, C, L = x.shape
    H = w1.shape[1]
    itemsize = jnp.dtype(x.dtype).itemsize

    # Cast weights once in the wrapper; they stay VMEM-resident in-kernel.
    w1 = w1.astype(jnp.float32)
    w2 = w2.astype(jnp.float32)

    bt = _pick_block_b(B, C, L, itemsize)
    grid = (B // bt,)

    block_bytes = bt * C * L * itemsize
    w_bytes = (C * H + H * C) * 4
    # 2x double-buffered input + 2x output + weights + slack, floor at 16 MiB.
    vmem_limit = max(4 * block_bytes + w_bytes + (2 << 20), 16 << 20)

    cost = pl.CostEstimate(
        flops=2 * B * C * L + 4 * B * C * H,
        transcendentals=B * C,
        bytes_accessed=2 * B * C * L * itemsize + w_bytes,
    )

    return pl.pallas_call(
        se_kernel,
        out_shape=jax.ShapeDtypeStruct((B, C, L), x.dtype),
        grid_spec=pltpu.PrefetchScalarGridSpec(
            num_scalar_prefetch=0,
            grid=grid,
            in_specs=[
                pl.BlockSpec((bt, C, L), lambda b: (b, 0, 0)),
                pl.BlockSpec((C, H), lambda b: (0, 0)),
                pl.BlockSpec((H, C), lambda b: (0, 0)),
            ],
            out_specs=pl.BlockSpec((bt, C, L), lambda b: (b, 0, 0)),
        ),
        compiler_params=pltpu.CompilerParams(
            dimension_semantics=("parallel",),
            vmem_limit_bytes=int(vmem_limit),
        ),
        cost_estimate=cost,
    )(x, w1, w2)


def se_layer_1d_ref(x, w1, w2):
    y = jnp.mean(x.astype(jnp.float32), axis=-1)
    h = jnp.maximum(y @ w1.astype(jnp.float32), 0.0)
    s = jax.nn.sigmoid(h @ w2.astype(jnp.float32))
    return (x.astype(jnp.float32) * s[:, :, None]).astype(x.dtype)


if __name__ == "__main__":
    # channel must be >= reduction so channel // reduction >= 1
    B, C, L = 2, 32, 128
    reduction = 16
    H = C // reduction  # 2

    key = jax.random.PRNGKey(0)
    kx, k1, k2 = jax.random.split(key, 3)
    x = jax.random.normal(kx, (B, C, L), dtype=jnp.float32)
    # Deterministic synthetic weights (stored pre-transposed vs PyTorch Linear).
    w1 = jax.random.normal(k1, (C, H), dtype=jnp.float32) * 0.1   # = W1^T
    w2 = jax.random.normal(k2, (H, C), dtype=jnp.float32) * 0.1   # = W2^T

    out = se_layer_1d(x, w1, w2)
    out = jax.block_until_ready(out)

    ref = se_layer_1d_ref(x, w1, w2)
    assert out.shape == (B, C, L)
    assert jnp.allclose(out, ref, atol=1e-5, rtol=1e-5), "mismatch vs reference"

    print("KERNEL_OK")
</pallas_src>

<mosaic_0001>
module attributes {stable_mosaic.version = 11 : i64} {
  func.func @se_kernel(%arg0: i32, %arg1: memref<1x32x128xf32, #tpu.memory_space<vmem>>, %arg2: memref<32x2xf32, #tpu.memory_space<vmem>>, %arg3: memref<2x32xf32, #tpu.memory_space<vmem>>, %arg4: memref<1x32x128xf32, #tpu.memory_space<vmem>>) attributes {dimension_semantics = [#tpu.dimension_semantics<parallel>], iteration_bounds = array<i64: 2>, scalar_prefetch = 0 : i64, scratch_operands = 0 : i64, tpu.core_type = #tpu.core_type<tc>, window_params = [{transform_indices = @transform_0, window_bounds = array<i64: 1, 32, 128>}, {pipeline_mode = #tpu.pipeline_mode<synchronous>, transform_indices = @transform_1, window_bounds = array<i64: 32, 2>}, {pipeline_mode = #tpu.pipeline_mode<synchronous>, transform_indices = @transform_2, window_bounds = array<i64: 2, 32>}, {transform_indices = @transform_3, window_bounds = array<i64: 1, 32, 128>}]} {
    %c0 = arith.constant 0 : index
    %c0_0 = arith.constant 0 : index
    %c0_1 = arith.constant 0 : index
    %0 = vector.load %arg1[%c0, %c0_0, %c0_1] : memref<1x32x128xf32, #tpu.memory_space<vmem>>, vector<1x32x128xf32>
    %cst = arith.constant dense<0.000000e+00> : vector<1x32xf32>
    %1 = vector.multi_reduction <add>, %0, %cst [2] : vector<1x32x128xf32> to vector<1x32xf32>
    %cst_2 = arith.constant 7.812500e-03 : f32
    %2 = vector.broadcast %cst_2 : f32 to vector<1x32xf32>
    %3 = arith.mulf %1, %2 : vector<1x32xf32>
    %c0_3 = arith.constant 0 : index
    %c0_4 = arith.constant 0 : index
    %4 = vector.load %arg2[%c0_3, %c0_4] : memref<32x2xf32, #tpu.memory_space<vmem>>, vector<32x2xf32>
    %cst_5 = arith.constant dense<0.000000e+00> : vector<1x2xf32>
    %5 = tpu.matmul %3, %4, %cst_5 {dimension_numbers = #tpu.dot_dimension_numbers<[1], [0], [0], [1], [0, 0, 1, 1], [], []>} : vector<1x32xf32>, vector<32x2xf32>, vector<1x2xf32> -> vector<1x2xf32>
    %cst_6 = arith.constant 0.000000e+00 : f32
    %6 = vector.broadcast %cst_6 : f32 to vector<1x2xf32>
    %7 = arith.maximumf %5, %6 : vector<1x2xf32>
    %c0_7 = arith.constant 0 : index
    %c0_8 = arith.constant 0 : index
    %8 = vector.load %arg3[%c0_7, %c0_8] : memref<2x32xf32, #tpu.memory_space<vmem>>, vector<2x32xf32>
    %cst_9 = arith.constant dense<0.000000e+00> : vector<1x32xf32>
    %9 = tpu.matmul %7, %8, %cst_9 {dimension_numbers = #tpu.dot_dimension_numbers<[1], [0], [0], [1], [0, 0, 1, 1], [], []>} : vector<1x2xf32>, vector<2x32xf32>, vector<1x32xf32> -> vector<1x32xf32>
    %10 = arith.negf %9 : vector<1x32xf32>
    %11 = math.exp %10 : vector<1x32xf32>
    %cst_10 = arith.constant 1.000000e+00 : f32
    %12 = vector.broadcast %cst_10 : f32 to vector<1x32xf32>
    %13 = arith.addf %12, %11 : vector<1x32xf32>
    %14 = arith.divf %12, %13 : vector<1x32xf32>
    %15 = vector.shape_cast %14 : vector<1x32xf32> to vector<1x32x1xf32>
    %16 = vector.broadcast %15 : vector<1x32x1xf32> to vector<1x32x128xf32>
    %17 = arith.mulf %0, %16 : vector<1x32x128xf32>
    %c0_11 = arith.constant 0 : index
    %c0_12 = arith.constant 0 : index
    %c0_13 = arith.constant 0 : index
    %18 = vector.load %arg4[%c0_11, %c0_12, %c0_13] : memref<1x32x128xf32, #tpu.memory_space<vmem>>, vector<1x32x128xf32>
    tpu.vector_store %arg4[%c0_11, %c0_12, %c0_13], %17 {strides = array<i32>} : memref<1x32x128xf32, #tpu.memory_space<vmem>>, vector<1x32x128xf32>,
    return
  }
  func.func @transform_0(%arg0: i32) -> (i32, i32, i32) {
    %c0_i32 = arith.constant 0 : i32
    %c0_i32_0 = arith.constant 0 : i32
    %c0_i32_1 = arith.constant 0 : i32
    return %arg0, %c0_i32, %c0_i32_0 : i32, i32, i32
  }
  func.func @transform_1(%arg0: i32) -> (i32, i32) {
    %c0_i32 = arith.constant 0 : i32
    %c0_i32_0 = arith.constant 0 : i32
    %c0_i32_1 = arith.constant 0 : i32
    return %c0_i32, %c0_i32_0 : i32, i32
  }
  func.func @transform_2(%arg0: i32) -> (i32, i32) {
    %c0_i32 = arith.constant 0 : i32
    %c0_i32_0 = arith.constant 0 : i32
    %c0_i32_1 = arith.constant 0 : i32
    return %c0_i32, %c0_i32_0 : i32, i32
  }
  func.func @transform_3(%arg0: i32) -> (i32, i32, i32) {
    %c0_i32 = arith.constant 0 : i32
    %c0_i32_0 = arith.constant 0 : i32
    %c0_i32_1 = arith.constant 0 : i32
    return %arg0, %c0_i32, %c0_i32_0 : i32, i32, i32
  }
}

</mosaic_0001>

<bundles_post_ra>
// kernel: tpu_custom_call.1
= control target key start
LH: loop header
LB: loop body
LE: loop exit
PB: predicated region body
PF: predicated region fallthrough
CT: control target
= control target key end

     0   :  { %8 = vsyncpa [#allocation3], 0  ;;  %s943_s0 = inlined_call_operand.hbm [shape: f32[2,32,128], index: 0, kind: input, shape index: {}]   ;;  %s944_s1 = inlined_call_operand.vmem [shape: f32[32,2], index: 1, kind: input, shape index: {}]   ;;  %s945_s2 = inlined_call_operand.vmem [shape: f32[2,32], index: 2, kind: input, shape index: {}]   ;;  %s946_s3 = inlined_call_operand.hbm [shape: f32[2,32,128], index: 3, kind: output, shape index: {}]  }
   0x1   :  { %10 = vsyncpa [#allocation3 + $0x1], 0 }
   0x2   :  { %11 = vsyncpa [#allocation4], 0 }
   0x3   :  { %13 = vsyncpa [#allocation4 + $0x1], 0  ;;  %s746_s12 = smov 0   ;;  %s748_s13 = smov 0  }
   0x4   :  { %s750_s14 = smov 0   ;;  %s752_s15 = smov 0  }
   0x5 LB: > { %s767_s16 = sadd.s32 4294967295, %s715_s15   ;;  %s513_s17 = sadd.s32 4294967294, %s715_s15   ;;  %s715_s15 = sphi %s752_s15, %s959_s15   ;;  %s711_s14 = sphi %s750_s14, %s958_s14   ;;  %s707_s13 = sphi %s748_s13, %s957_s13   ;;  %s703_s12 = sphi %s746_s12, %s956_s12  }
   0x6   : > { %s771_s18 = sadd.s32 1, %s715_s15   ;;  %s26_s19 = sadd.s32 1, %s711_s14 }
   0x7   : > { %s23_s20 = ssub.s32 %s715_s15, %s771_s18  ;;  %p33_p0 = scmp.ne.s32.totalorder %s711_s14, %s707_s13 }
   0x8   : > { %p24_p1 = scmp.eq.s32.totalorder %s23_s20, 0  ;;  %p34_p2 = scmp.eq.s32.totalorder %s715_s15, 0 }
   0x9   : > { %p39_p3 = scmp.ne.s32.totalorder %s707_s13, %s703_s12  ;;  %p40_p4 = scmp.eq.s32.totalorder %s767_s16, 0 }
   0xa   : > { %s783_s21 = scalar_select %p24_p1, %s711_s14, %s26_s19  }
   0xb   : > { %p785_p5 = por %p34_p2, %p33_p0  ;;  %p789_p6 = por %p40_p4, %p39_p3 }
   0xc   : > { %p105_p7 = scmp.eq.s32.totalorder %s767_s16, 1  ;;  %p111_p8 = scmp.eq.s32.totalorder %s513_s17, 1 }
   0xd   : > { %p574_p10 = scmp.lt.s32.totalorder %s715_s15, 2  ;;  %s137_s26 = sand.u32 1, %s711_s14  }
   0xe   : > { %p796_p11 = por %p105_p7, %p33_p0  ;;  %p800_p12 = por %p111_p8, %p39_p3 }
   0xf   : > { %s531_s27 = sshll.u32 %s715_s15, 9  ;;  %s516_s28 = sshll.u32 %s137_s26, 5 }
  0x10   : > { %s950_s24 = scalar_select %p796_p11, 1, 0 }
  0x11   : > { %s951_s25 = scalar_select %p800_p12, 1, 0 }
  0x12   : > { %s809_s4 = scalar_lea.hbm %s943_s0, %s531_s27  ;;  %s141_s5 = scalar_lea.vmem [#allocation2], %s516_s28 }
  0x13   : > { %s148_s6 = sshll.u32 %s141_s5, 4  ;;  %p813_p13 = pnand %p574_p10, %p785_p5  ;;  %s817_s6 = int_to_ptr.vmem [resolvable:$true] %s148_s6 }
  0x14   : > { %s819_s8 = scalar_lea.sflag [#allocation3], %s137_s26  ;;  %s619_s9 = scalar_lea.hbm %s809_s4, 512 }
  0x15   : > { %p620_p0 = scmp.ne.s32.totalorder %s809_s4, %s619_s9  ;;  %p621_p1 = pneg %p813_p13 }
  0x16   : > { %s624_s17 = scalar_lea.hbm %s943_s0, 1024  ;;  %p625_p4 = scmp.lt.u32.totalorder %s809_s4, %s943_s0 }
  0x17   : > { %p622_p2 = pnand %p621_p1, %p620_p0  ;;  %p626_p5 = scmp.lt.u32.totalorder %s624_s17, %s619_s9 }
  0x18   : > { %p628_p8 = scmp.lt.u32.totalorder %s619_s9, %s809_s4 }
  0x19   : > { %p623_p3 = pneg %p622_p2  ;;  %p627_p7 = por %p626_p5, %p625_p4 }
  0x1b   : > { %p629_p10 = por %p628_p8, %p627_p7 }
  0x1d   : > { %p630_p9 = pnand %p629_p10, %p623_p3 }
  0x1f   : > { %633 = shalt.err (!%p630_p9)
}
  0x20   : > { %s634_s22 = scalar_lea.vmem %s817_s6, 512  ;;  %s717_s26 = smov [#allocation2]  }
  0x21   : > { %p635_p0 = scmp.ne.s32.totalorder %s817_s6, %s634_s22  ;;  %s639_s27 = sshll.u32 %s717_s26, 4  ;;  %s640_s27 = int_to_ptr.vmem [resolvable:$false] %s639_s27 }
  0x22   : > { %s641_s28 = scalar_lea.vmem %s640_s27, 1024  ;;  %p642_p11 = scmp.lt.s32.totalorder %s817_s6, %s640_s27 }
  0x23   : > { %p637_p2 = pnand %p635_p0, %p621_p1  ;;  %p643_p4 = scmp.lt.s32.totalorder %s641_s28, %s634_s22 }
  0x25   : > { %p638_p12 = pneg %p637_p2  ;;  %p644_p5 = por %p643_p4, %p642_p11 }
  0x27   : > { %p645_p7 = pnand %p644_p5, %p638_p12 }
  0x29   : > { %648 = shalt.err (!%p645_p7)
}
  0x2a   : > { %s718_s29 = smov 128   ;;  %s719_s30 = smov 8  }
  0x2b   : > { %569 = dma.hbm_to_vmem [thread:$0]  (!%p813_p13), %s809_s4, 512, %s817_s6, %s819_s8, %s718_s29, %s718_s29, %s719_s30  }
  0x2c   : > { %p519_p9 = scmp.ge.s32.totalorder %s715_s15, 1  ;;  %p156_p1 = scmp.lt.s32.totalorder %s715_s15, 3 }
  0x2e   : > { %p157_p3 = pnand %p519_p9, %p156_p1 }
  0x2f   : > { %s850_s5 = sand.u32 (!%p157_p3), 1, %s707_s13  }
  0x30   : > { %160 = sbr.rel (%p157_p3) target bundleno = 804 (0x324), region = 32  ;;  %s520_s9 = sshll.u32 (!%p157_p3), %s850_s5, 5 }
  0x31   : > { %s163_s10 = scalar_lea.sflag (!%p157_p3), [#allocation3], %s850_s5  ;;  %s166_s11 = scalar_lea.vmem (!%p157_p3), [#allocation2], %s520_s9 }
  0x37   : > { %694 = dma.done.wait (%p789_p6), %s163_s10, 512  }
  0x38   : > { %696 = vsyncadd (%p789_p6), %s163_s10, 4294966784  ;;  %v860_v0 = vld [vmem:[%s166_s11] sm:$0xff]  ;;  %v862_v1 = vld [vmem:[%s166_s11 + $0x10] sm:$0xff]  ;;  %v720_v6 = vmov 0.0|0.0   ;;  %vm721_vm0 = vmmov 0   ;;  %v722_v11 = vmov 0.0   ;;  %v213_v12 = vlaneseq }
  0x39   : > { %193 = vadd.xlane.f32.xlu0 %v860_v0  ;;  %197 = vadd.xlane.f32.xlu1 %v862_v1  ;;  %v866_v2 = vld [vmem:[%s166_s11 + $0x8] sm:$0xff]  ;;  %v868_v3 = vld [vmem:[%s166_s11 + $0x18] sm:$0xff]  ;;  %v205_v4 = vld [vmem:[%s944_s1] sm:$0xff]  ;;  %vm224_vm1 = vcmask 130112   ;;  %vm231_vm2 = vcmask 195712   ;;  %vm238_vm3 = vcmask 261312  }
  0x3a   : > { %v206_v5 = vld [vmem:[%s944_s1 + $0x8] sm:$0xff]  ;;  %556 = vmatprep.subr.bf16.mxu0 %v720_v6  ;;  %v207_v8 = vld [vmem:[%s944_s1 + $0x10] sm:$0xff]  ;;  %v208_v9 = vld [vmem:[%s944_s1 + $0x18] sm:$0xff]  ;;  %548 = vmatprep.mubr.msk.f32.mxu0 %vm721_vm0, %v722_v11  ;;  %v214_v13 = vand.u32 127, %v213_v12  ;;  %v216_v14 = vshrl.u32 %v213_v12, 7  ;;  %vm240_vm4 = vcmask 261120  }
  0x3b   : > { %v557_v7 = vpack.c.bf16 %v206_v5, %v205_v4  ;;  %v560_v10 = vpack.c.bf16 %v208_v9, %v207_v8  ;;  %551 = vmatprep.subr.mxu1 %v722_v11  ;;  %553 = vmatprep.mubr.msk.f32.mxu1 %vm721_vm0, %v722_v11  ;;  %v314_v37 = vld [vmem:[%s945_s2] sm:$0x3]  ;;  %vm319_vm5 = vcmask 1041408   ;;  %vm315_vm6 = vcmask 15360   ;;  %s188_s27 = scalar_lea.vmem [#allocation5], %s520_s9  ;;  %s532_s29 = sshll.u32 %s767_s16, 9 }
  0x3c   : > { %v219_v15 = vadd.s32 4294967288, %v214_v13  ;;  %v233_v16 = vadd.s32 4294967272, %v214_v13  ;;  %v226_v18 = vadd.s32 4294967280, %v214_v13  ;;  %v217_v20 = vsub.s32 %v214_v13, %v216_v14  ;;  %552 = vmatpush3.msk.msra.mxu1 %vm319_vm5, %v314_v37  ;;  %s440_s28 = sshll.u32 %s188_s27, 4  ;;  %s898_s11 = scalar_lea.hbm %s946_s3, %s532_s29  ;;  %s893_s28 = int_to_ptr.vmem [resolvable:$true] %s440_s28 }
  0x3d   : > { %195 = vadd.xlane.f32.xlu0 %v866_v2  ;;  %199 = vadd.xlane.f32.xlu1 %v868_v3  ;;  %v401_v46 = vsub.s32 0, %v216_v14  ;;  %s427_s9 = scalar_lea.sflag [#allocation4], %s850_s5  ;;  %s649_s4 = scalar_lea.vmem %s893_s28, 512 }
  0x3e   : > { %558 = vmatpush3.bf16.msra.mxu0 %v557_v7  ;;  %v222_v22 = vsub.s32 %v219_v15, %v216_v14  ;;  %v236_v23 = vsub.s32 %v233_v16, %v216_v14  ;;  %v229_v24 = vsub.s32 %v226_v18, %v216_v14  ;;  %p650_p6 = scmp.ne.s32.totalorder %s893_s28, %s649_s4  ;;  %p953_p11 = scmp.ne.s32.totalorder %s950_s24, 0 }
  0x3f   : > { %559 = vmatprep.subr.bf16.mxu0 %v720_v6  ;;  %s723_s16 = smov [#allocation5]  }
  0x40   : > { %p651_p12 = pnand %p650_p6, %p953_p11  ;;  %s653_s6 = sshll.u32 %s723_s16, 4  ;;  %s654_s6 = int_to_ptr.vmem [resolvable:$false] %s653_s6 }
  0x41   : > { %s655_s23 = scalar_lea.vmem %s654_s6, 1024  ;;  %p656_p8 = scmp.lt.s32.totalorder %s893_s28, %s654_s6 }
  0x42   : > { %561 = vmatpush3.bf16.msra.mxu0 %v560_v10  ;;  %p652_p13 = pneg %p651_p12  ;;  %p657_p10 = scmp.lt.s32.totalorder %s655_s23, %s649_s4 }
  0x44   : > { %p658_p0 = por %p657_p10, %p656_p8 }
  0x46   : > { %p659_p2 = pnand %p658_p0, %p652_p13 }
  0xc6   : > { %v194_v17 = vpop.xlane.xlu0 %193  ;;  %v198_v19 = vpop.xlane.xlu1 %197 }
  0xc7   : > { %v201_v21 = vmul.f32 0.0078125, %v194_v17  ;;  %v203_v25 = vmul.f32 0.0078125, %v198_v19 }
  0xc9   : > { %v218_v30 = vrot.slane %v201_v21, %v217_v20  ;;  %v230_v33 = vrot.slane %v203_v25, %v229_v24 }
  0xca   : > { %v196_v26 = vpop.xlane.xlu0 %195  ;;  %v200_v27 = vpop.xlane.xlu1 %199 }
  0xcb   : > { %v202_v28 = vmul.f32 0.0078125, %v196_v26  ;;  %v204_v29 = vmul.f32 0.0078125, %v200_v27 }
  0xcd   : > { %v223_v31 = vrot.slane %v202_v28, %v222_v22  ;;  %v237_v32 = vrot.slane %v204_v29, %v236_v23 }
  0xcf   : > { %v225_v34 = vsel %vm224_vm1, %v223_v31, %v218_v30 }
  0xd0   : > { %v232_v35 = vsel %vm231_vm2, %v230_v33, %v225_v34 }
  0xd1   : > { %v239_v36 = vsel %vm238_vm3, %v237_v32, %v232_v35 }
  0xd2   : > { %549 = vmatmul.mubr.msk.f32.vlgmr.msra.gmra.mrb[0].mxu0 %vm240_vm4, %v239_v36 }
 0x1a5   : > { %v309_v38 = vpop.f32.mrb[0].mxu0 }
 0x1a6   : > { %v313_v39 = vmax.f32 %v309_v38, 0.0  ;;  %v550_v40 = vpop.f32.mrb[1].mxu0 }
 0x1a8   : > { %554 = vmatmul.mubr.msk.f32.vlgmr.msra.gmra.mrb[0].mxu1 %vm315_vm6, %v313_v39 }
 0x27b   : > { %v389_v41 = vpop.f32.mrb[0].mxu1 }
 0x27c   : > { %v525_v42 = vmul.f32 -1.442695, %v389_v41  ;;  %v555_v43 = vpop.f32.mrb[1].mxu1 }
 0x27e   : > { %615 = vpow2.f32 %v525_v42 }
 0x288   : > { %v616_v44 = vpop.eup %615 }
 0x289   : > { %v396_v45 = vadd.f32 1.0, %v616_v44 }
 0x28b   : > { %617 = vrcp.f32 %v396_v45 }
 0x295   : > { %v618_v47 = vpop.eup %617 }
 0x296   : > { %v402_v48 = vrot.slane %v618_v47, %v401_v46 }
 0x298   : > { %408 = vbcast.lane.b32.xlu1 %v402_v48, 264  ;;  %404 = vbcast.lane.b32.xlu0 %v402_v48, 256 }
 0x29c   : > { %412 = vbcast.lane.b32.xlu1 %v402_v48, 272 }
 0x2a0   : > { %416 = vbcast.lane.b32.xlu1 %v402_v48, 280 }
 0x30a   : > { %v409_v49 = vpop.permute.xlu1 %408  ;;  %v405_v50 = vpop.permute.xlu0 %404 }
 0x30b   : > { %v419_v51 = vmul.f32 %v409_v49, %v866_v2  ;;  %v418_v52 = vmul.f32 %v405_v50, %v860_v0 }
 0x30d   : > { %423 = vst [vmem:[%s188_s27 + $0x8] sm:$0xff] %v419_v51  ;;  %422 = vst [vmem:[%s188_s27] sm:$0xff] %v418_v52 }
 0x30e   : > { %v413_v53 = vpop.permute.xlu1 %412 }
 0x30f   : > { %v420_v54 = vmul.f32 %v413_v53, %v862_v1 }
 0x311   : > { %424 = vst [vmem:[%s188_s27 + $0x10] sm:$0xff] %v420_v54 }
 0x312   : > { %v417_v55 = vpop.permute.xlu1 %416 }
 0x313   : > { %v421_v56 = vmul.f32 %v417_v55, %v868_v3 }
 0x315   : > { %425 = vst [vmem:[%s188_s27 + $0x18] sm:$0xff] %v421_v56 }
 0x316   : > { %662 = shalt.err (!%p659_p2)
}
 0x317   : > { %s663_s7 = scalar_lea.hbm %s898_s11, 512  ;;  %s667_s19 = scalar_lea.hbm %s946_s3, 1024 }
 0x318   : > { %p664_p4 = scmp.ne.s32.totalorder %s898_s11, %s663_s7  ;;  %p668_p9 = scmp.lt.u32.totalorder %s898_s11, %s946_s3 }
 0x319   : > { %p669_p1 = scmp.lt.u32.totalorder %s667_s19, %s663_s7  ;;  %p671_p6 = scmp.lt.u32.totalorder %s663_s7, %s898_s11 }
 0x31a   : > { %p665_p5 = pnand %p664_p4, %p953_p11 }
 0x31b   : > { %p670_p3 = por %p669_p1, %p668_p9 }
 0x31c   : > { %p666_p7 = pneg %p665_p5 }
 0x31d   : > { %p672_p12 = por %p671_p6, %p670_p3 }
 0x31f   : > { %p673_p13 = pnand %p672_p12, %p666_p7 }
 0x321   : > { %676 = shalt.err (!%p673_p13)
}
 0x322   : > { %s724_s26 = smov 128   ;;  %s725_s27 = smov 8  }
 0x323   : > { %564 = dma.vmem_to_hbm [thread:$0]  (%p953_p11), %s893_s28, 512, %s898_s11, %s427_s9, %s724_s26, %s724_s26, %s725_s27  }
 0x324 PF: > { %s455_s29 = sand.u32 1, %s703_s12   ;;  %p954_p8 = scmp.ne.s32.totalorder %s951_s25, 0 }
 0x325   : > { %p955_p10 = scmp.ge.s32.totalorder %s715_s15, 2  ;;  %s456_s30 = scalar_lea.sflag [#allocation4], %s455_s29 }
 0x327   : > { %p571_p0 = pnand %p955_p10, %p954_p8 }
 0x329   : > { %698 = dma.done.wait (!%p571_p0), %s456_s30, 512  }
 0x32a   : > { %700 = vsyncadd (!%p571_p0), %s456_s30, 4294966784  ;;  %p16_p2 = scmp.ge.s32.totalorder %s771_s18, 4   ;;  %s956_s12 = smov %s707_s13 }
 0x32b   : > { %s957_s13 = smov %s711_s14  ;;  %s958_s14 = smov %s783_s21 }
 0x32c   : > { %s959_s15 = smov %s771_s18  ;;  %18 = sbr.rel (!%p16_p2) target bundleno = 5 (0x5), region = 77 }
 0x333   :  { %461 = vsyncpa [#allocation3], 1 }
 0x334   :  { %463 = vsyncpa [#allocation3 + $0x1], 1 }
 0x335   :  { %464 = vsyncpa [#allocation4], 1 }
 0x336   :  { %466 = vsyncpa [#allocation4 + $0x1], 1 }

</bundles_post_ra>
